<compile_context>
chip_gen: v6e
topology: v6e:2x2x1
jax: 0.10.0
libtpu: 0.0.40
codegen_flags: <defaults>
</compile_context>

<pallas_src>
import functools

import jax
import jax.numpy as jnp
from jax.experimental import pallas as pl
from jax.experimental.pallas import tpu as pltpu

IGNORE_LABEL = 255  # config.IGNORE_LABEL stand-in


def _class_loop(num_classes, body, init):
    """Loop over classes.  Fully unrolled for small c (scheduler visibility),
    lax.fori_loop with dynamic leading-axis ref indexing otherwise."""
    if num_classes <= 32:
        carry = init
        for k in range(num_classes):
            carry = body(k, carry)
        return carry
    return jax.lax.fori_loop(0, num_classes, body, init)


def _ce2d_kernel(*refs, ignore_label, num_classes, h_total, tile_h,
                 mask_tail, has_weight):
    if has_weight:
        pred_ref, tgt_ref, w_ref, out_ref, acc_loss, acc_w = refs
    else:
        pred_ref, tgt_ref, out_ref, acc_loss, acc_w = refs
        w_ref = None

    jh = pl.program_id(2)  # h-tile index (reduction axis, "arbitrary")

    @pl.when(jh == 0)
    def _init():
        acc_loss[...] = jnp.zeros_like(acc_loss)
        acc_w[...] = jnp.zeros_like(acc_w)

    t = tgt_ref[...]                                   # (th, w) int32
    if mask_tail:
        # The last h-tile may extend past h: force those targets to
        # ignore_label (two cheap (th, w) ops, only when a tail exists).
        row = jax.lax.broadcasted_iota(jnp.int32, t.shape, 0) + jh * tile_h
        t = jnp.where(row < h_total, t, ignore_label)

    valid = jnp.logical_and(t >= 0, t != ignore_label)
    validf = valid.astype(jnp.float32)                 # (th, w)

    in_dtype = pred_ref.dtype
    zero_in = jnp.zeros(t.shape, in_dtype)
    neg_inf = jnp.full(t.shape, -jnp.inf, in_dtype)
    zero_f32 = jnp.zeros(t.shape, jnp.float32)

    # Pass 1: running max over classes + where-select gather of the target
    # logit (and optional per-class weight from SMEM).  Only one (th, w) slab
    # per class is live; no (c, th, w) temporaries.  Max/selects stay in the
    # native dtype (half-width vregs for bf16 inputs on v6e/v7x).
    def pass1(k, carry):
        xk = pred_ref[k]                               # (th, w), native dtype
        eq = t == k
        if has_weight:
            m, tl, pw = carry
            pw = pw + jnp.where(eq, w_ref[k], 0.0)     # scalar SMEM read
            m = jnp.maximum(m, xk)
            tl = tl + jnp.where(eq, xk, zero_in)
            return m, tl, pw
        m, tl = carry
        m = jnp.maximum(m, xk)
        tl = tl + jnp.where(eq, xk, zero_in)
        return m, tl

    if has_weight:
        m, tgt_logit, cls_w = _class_loop(num_classes, pass1,
                                          (neg_inf, zero_in, zero_f32))
        pix_w = cls_w * validf
    else:
        m, tgt_logit = _class_loop(num_classes, pass1, (neg_inf, zero_in))
        # NOTE: labels in [c, ignore_label) get weight 1 and nll = lse here;
        # PyTorch would raise at runtime for such labels.
        pix_w = validf

    m32 = m.astype(jnp.float32)

    # Pass 2: exp-sum (EUP).  Upcast to f32 only at the exp/accumulate step.
    def pass2(k, s):
        return s + jnp.exp(pred_ref[k].astype(jnp.float32) - m32)

    s = _class_loop(num_classes, pass2, zero_f32)

    lse = jnp.log(s) + m32
    nll = lse - tgt_logit.astype(jnp.float32)

    # Mask per-pixel results only: tail rows / ignored pixels may carry Inf/NaN
    # through exp, and a bare nll * 0 would then be NaN.
    acc_loss[...] += jnp.where(valid, nll * pix_w, 0.0)
    acc_w[...] += pix_w

    @pl.when(jh == pl.num_programs(2) - 1)
    def _finalize():
        lane = jax.lax.broadcasted_iota(jnp.int32, (1, 128), 1)
        ls = jnp.sum(acc_loss[...]).reshape(1, 1)
        ws = jnp.sum(acc_w[...]).reshape(1, 1)
        # Lane-dense packing: lane 0 = weighted loss sum, lane 1 = weight sum.
        out_ref[...] = (jnp.where(lane == 0, ls, 0.0)
                        + jnp.where(lane == 1, ws, 0.0))


def _round_down(x, m):
    return (x // m) * m


def _vmem_capacity_bytes():
    """Physical VMEM per TensorCore (64 MiB on v7x, 128 MiB on v5e/v6e)."""
    try:
        info = pltpu.get_tpu_info()
        cap = getattr(info, "vmem_capacity_bytes", None)
        if cap:
            return int(cap)
    except Exception:
        pass
    return 64 * 1024 * 1024  # conservative (v7x per-TC)


def _choose_tile_h(c, h, w_blk, itemsize, sub, budget):
    # Per h-row VMEM cost:
    #   * double-buffered predict rows (native dtype DMA)
    #   * double-buffered int32 target rows
    #   * two f32 accumulators
    #   * ~8 live (th, w) f32 temporaries in the kernel body (m, tgt_logit,
    #     pix_w, s, x_k, exp slab, lse/nll, valid mask) — the per-class loop
    #     keeps this independent of c.
    per_row = (2 * c * w_blk * itemsize
               + 2 * w_blk * 4
               + 2 * w_blk * 4
               + 8 * w_blk * 4)
    rows = int(budget // max(per_row, 1))
    if rows >= h:
        return h
    return max(sub, _round_down(rows, sub))


def cross_entropy_2d(predict, target, weight=None, *, size_average=True,
                     ignore_label=IGNORE_LABEL, tile_h=None,
                     vmem_budget_bytes=None):
    """JAX/Pallas equivalent of CrossEntropy2d.forward.

    predict: (n, c, h, w) float logits (NCHW, any float dtype; upcast in-kernel)
    target:  (n, h, w) integer labels; label < 0 or == ignore_label is ignored
    weight:  optional (c,) per-class rescaling weights
    Returns a scalar loss (0.0 if there are no valid pixels).
    """
    n, c, h, w = predict.shape
    assert target.shape == (n, h, w), (predict.shape, target.shape)
    target = target.astype(jnp.int32)

    itemsize = jnp.dtype(predict.dtype).itemsize
    sub = max(8, 32 // max(itemsize, 1))   # sublane multiple for this dtype

    # Megacore: when n == 1 the batch axis alone cannot feed both v7x
    # TensorCores; split W into two lane-dense (multiple-of-128) blocks.
    num_wb = 2 if (n == 1 and w % 256 == 0) else 1
    w_blk = w // num_wb

    # Generation-aware VMEM limit with headroom (~48 MiB on v7x, ~96 MiB on
    # v5e/v6e); raise the scoped default instead of shrinking tiles.
    cap = _vmem_capacity_bytes()
    vmem_limit = int(min(cap * 3 // 4, 96 * 1024 * 1024))
    if vmem_budget_bytes is None:
        vmem_budget_bytes = vmem_limit - (1 << 20)

    if tile_h is None:
        tile_h = _choose_tile_h(c, h, w_blk, itemsize, sub, vmem_budget_bytes)
    tile_h = min(tile_h, h)
    if tile_h != h and tile_h % sub != 0:
        tile_h = max(sub, _round_down(tile_h, sub))

    num_ht = -(-h // tile_h)
    mask_tail = (h % tile_h) != 0
    has_weight = weight is not None

    in_specs = [
        # predict: (n, c, h, w) -> (c, th, w_blk) tiles, native dtype straight
        # from HBM (no transpose / pad / upcast passes).
        pl.BlockSpec((None, c, tile_h, w_blk), lambda i, wb, jh: (i, 0, jh, wb)),
        # target: (n, h, w) -> (th, w_blk) int32 tiles.
        pl.BlockSpec((None, tile_h, w_blk), lambda i, wb, jh: (i, jh, wb)),
    ]
    args = [predict, target]
    if has_weight:
        # Flat (c,) f32 class weights in SMEM: cheap scalar-indexed reads.
        wvec = jnp.asarray(weight, jnp.float32).reshape(c)
        in_specs.append(pl.BlockSpec(memory_space=pltpu.MemorySpace.SMEM))
        args.append(wvec)

    kernel = functools.partial(
        _ce2d_kernel, ignore_label=ignore_label, num_classes=c,
        h_total=h, tile_h=tile_h, mask_tail=mask_tail, has_weight=has_weight)

    bytes_accessed = (n * c * h * w * itemsize + n * h * w * 4
                      + n * num_wb * 128 * 4 + (c * 4 if has_weight else 0))
    cost = pl.CostEstimate(flops=8 * n * c * h * w,
                           transcendentals=n * (c + 1) * h * w,
                           bytes_accessed=bytes_accessed)

    out = pl.pallas_call(
        kernel,
        out_shape=jax.ShapeDtypeStruct((n, num_wb, 1, 128), jnp.float32),
        grid_spec=pltpu.PrefetchScalarGridSpec(
            num_scalar_prefetch=0,
            grid=(n, num_wb, num_ht),
            in_specs=in_specs,
            out_specs=pl.BlockSpec((None, None, 1, 128),
                                   lambda i, wb, jh: (i, wb, 0, 0)),
            scratch_shapes=[pltpu.VMEM((tile_h, w_blk), jnp.float32),
                            pltpu.VMEM((tile_h, w_blk), jnp.float32)],
        ),
        compiler_params=pltpu.CompilerParams(
            dimension_semantics=("parallel", "parallel", "arbitrary"),
            vmem_limit_bytes=vmem_limit),
        cost_estimate=cost,
    )(*args)

    loss_sum = jnp.sum(out[:, :, 0, 0])
    w_sum = jnp.sum(out[:, :, 0, 1])

    if size_average:
        loss = jnp.where(w_sum > 0, loss_sum / jnp.maximum(w_sum, 1e-30), 0.0)
    else:
        loss = jnp.where(w_sum > 0, loss_sum, 0.0)
    # PyTorch returns torch.zeros(1) when no valid pixels; we return scalar 0.0.
    return loss


def _reference(predict, target, weight=None, size_average=True,
               ignore_label=IGNORE_LABEL):
    """Pure-JAX reference for verification."""
    n, c, h, w = predict.shape
    logits = jnp.transpose(predict, (0, 2, 3, 1)).reshape(-1, c).astype(jnp.float32)
    tgt = target.reshape(-1).astype(jnp.int32)
    valid = jnp.logical_and(tgt >= 0, tgt != ignore_label)
    logp = jax.nn.log_softmax(logits, axis=-1)
    safe_t = jnp.where(valid, tgt, 0)
    nll = -jnp.take_along_axis(logp, safe_t[:, None], axis=-1)[:, 0]
    wv = (jnp.ones((c,), jnp.float32) if weight is None
          else jnp.asarray(weight, jnp.float32))
    w_row = wv[safe_t]
    num = jnp.sum(nll * w_row * valid)
    den = jnp.sum(w_row * valid)
    if size_average:
        return jnp.where(den > 0, num / jnp.maximum(den, 1e-30), 0.0)
    return jnp.where(den > 0, num, 0.0)


if __name__ == "__main__":
    key = jax.random.PRNGKey(0)
    k1, k2, k3, k4, k5, k6 = jax.random.split(key, 6)

    # Test 1: unweighted, f32, shapes implied by the module (n, c, h, w).
    n, c, h, w = 2, 4, 16, 16
    predict = jax.random.normal(k1, (n, c, h, w), jnp.float32)
    target = jax.random.randint(k2, (n, h, w), 0, c).astype(jnp.int32)
    target = target.at[0, 0, :].set(IGNORE_LABEL)
    target = target.at[1, 3, 5].set(IGNORE_LABEL)

    loss = jax.block_until_ready(cross_entropy_2d(predict, target))
    ref = _reference(predict, target)
    assert jnp.allclose(loss, ref, rtol=1e-5, atol=1e-4), (loss, ref)

    loss_s = jax.block_until_ready(
        cross_entropy_2d(predict, target, size_average=False))
    ref_s = _reference(predict, target, size_average=False)
    assert jnp.allclose(loss_s, ref_s, rtol=1e-5, atol=1e-3), (loss_s, ref_s)

    # Test 2: per-class weights (SMEM scalar gather path).
    wgt = jnp.array([0.5, 1.0, 2.0, 0.25], jnp.float32)
    loss_w = jax.block_until_ready(cross_entropy_2d(predict, target, weight=wgt))
    ref_w = _reference(predict, target, weight=wgt)
    assert jnp.allclose(loss_w, ref_w, rtol=1e-5, atol=1e-4), (loss_w, ref_w)

    # Test 3: bf16 logits (native-dtype DMA, bf16 max/gather) + h not divisible
    # by the tile (exercises the in-kernel tail masking path).
    n3, c3, h3, w3 = 1, 5, 24, 16
    p3 = jax.random.normal(k3, (n3, c3, h3, w3), jnp.bfloat16)
    t3 = jax.random.randint(k4, (n3, h3, w3), 0, c3).astype(jnp.int32)
    t3 = t3.at[0, 7, :].set(IGNORE_LABEL)
    loss3 = jax.block_until_ready(cross_entropy_2d(p3, t3, tile_h=16))
    ref3 = _reference(p3, t3)
    assert jnp.allclose(loss3, ref3, rtol=1e-5, atol=1e-4), (loss3, ref3)

    # Test 4: n=1 with lane-friendly w -> W is split into 2 parallel blocks
    # (v7x megacore path; runs fine, just sequentially, on single-TC chips).
    n4, c4, h4, w4 = 1, 3, 16, 256
    p4 = jax.random.normal(k5, (n4, c4, h4, w4), jnp.float32)
    t4 = jax.random.randint(k6, (n4, h4, w4), 0, c4).astype(jnp.int32)
    t4 = t4.at[0, 2, 10:40].set(IGNORE_LABEL)
    loss4 = jax.block_until_ready(cross_entropy_2d(p4, t4))
    ref4 = _reference(p4, t4)
    assert jnp.allclose(loss4, ref4, rtol=1e-5, atol=1e-4), (loss4, ref4)

    # Test 5: no valid pixels -> 0.0 (PyTorch returns torch.zeros(1)).
    t_all_ignore = jnp.full((n, h, w), IGNORE_LABEL, jnp.int32)
    loss5 = jax.block_until_ready(cross_entropy_2d(predict, t_all_ignore))
    assert jnp.allclose(loss5, 0.0), loss5

    print("KERNEL_OK")
</pallas_src>

<mosaic_0001>
module attributes {stable_mosaic.version = 11 : i64} {
  func.func @_ce2d_kernel(%arg0: i32, %arg1: i32, %arg2: i32, %arg3: memref<1x4x16x16xf32, #tpu.memory_space<vmem>>, %arg4: memref<1x16x16xi32, #tpu.memory_space<vmem>>, %arg5: memref<1x1x1x128xf32, #tpu.memory_space<vmem>>, %arg6: memref<16x16xf32, #tpu.memory_space<vmem>>, %arg7: memref<16x16xf32, #tpu.memory_space<vmem>>) attributes {dimension_semantics = [#tpu.dimension_semantics<parallel>, #tpu.dimension_semantics<parallel>, #tpu.dimension_semantics<arbitrary>], iteration_bounds = array<i64: 2, 1, 1>, scalar_prefetch = 0 : i64, scratch_operands = 2 : i64, tpu.core_type = #tpu.core_type<tc>, window_params = [{transform_indices = @transform_0, window_bounds = array<i64: 1, 4, 16, 16>}, {transform_indices = @transform_1, window_bounds = array<i64: 1, 16, 16>}, {transform_indices = @transform_2, window_bounds = array<i64: 1, 1, 1, 128>}]} {
    %c0_i32 = arith.constant 0 : i32
    %0 = arith.cmpi eq, %arg2, %c0_i32 : i32
    %1 = arith.extui %0 : i1 to i32
    %c0_i32_0 = arith.constant 0 : i32
    %2 = arith.cmpi ne, %1, %c0_i32_0 : i32
    scf.if %2 {
      %cst_47 = arith.constant 0.000000e+00 : f32
      %78 = vector.broadcast %cst_47 : f32 to vector<16x16xf32>
      %c0_48 = arith.constant 0 : index
      %c0_49 = arith.constant 0 : index
      %79 = vector.load %arg6[%c0_48, %c0_49] : memref<16x16xf32, #tpu.memory_space<vmem>>, vector<16x16xf32>
      tpu.vector_store %arg6[%c0_48, %c0_49], %78 {strides = array<i32>} : memref<16x16xf32, #tpu.memory_space<vmem>>, vector<16x16xf32>,
      %cst_50 = arith.constant 0.000000e+00 : f32
      %80 = vector.broadcast %cst_50 : f32 to vector<16x16xf32>
      %c0_51 = arith.constant 0 : index
      %c0_52 = arith.constant 0 : index
      %81 = vector.load %arg7[%c0_51, %c0_52] : memref<16x16xf32, #tpu.memory_space<vmem>>, vector<16x16xf32>
      tpu.vector_store %arg7[%c0_51, %c0_52], %80 {strides = array<i32>} : memref<16x16xf32, #tpu.memory_space<vmem>>, vector<16x16xf32>,
    } else {
    }
    %c0 = arith.constant 0 : index
    %c0_1 = arith.constant 0 : index
    %c0_2 = arith.constant 0 : index
    %3 = vector.load %arg4[%c0, %c0_1, %c0_2] : memref<1x16x16xi32, #tpu.memory_space<vmem>>, vector<1x16x16xi32>
    %4 = vector.shape_cast %3 : vector<1x16x16xi32> to vector<16x16xi32>
    %c0_i32_3 = arith.constant 0 : i32
    %5 = vector.broadcast %c0_i32_3 : i32 to vector<16x16xi32>
    %6 = arith.cmpi sge, %4, %5 : vector<16x16xi32>
    %c255_i32 = arith.constant 255 : i32
    %7 = vector.broadcast %c255_i32 : i32 to vector<16x16xi32>
    %8 = arith.cmpi ne, %4, %7 : vector<16x16xi32>
    %9 = arith.andi %6, %8 : vector<16x16xi1>
    %10 = arith.extui %9 : vector<16x16xi1> to vector<16x16xi32>
    %11 = arith.sitofp %10 : vector<16x16xi32> to vector<16x16xf32>
    %cst = arith.constant 0.000000e+00 : f32
    %12 = vector.broadcast %cst : f32 to vector<16x16xf32>
    %cst_4 = arith.constant 0xFF800000 : f32
    %13 = vector.broadcast %cst_4 : f32 to vector<16x16xf32>
    %cst_5 = arith.constant 0.000000e+00 : f32
    %14 = vector.broadcast %cst_5 : f32 to vector<16x16xf32>
    %c0_6 = arith.constant 0 : index
    %c0_7 = arith.constant 0 : index
    %c0_8 = arith.constant 0 : index
    %c0_9 = arith.constant 0 : index
    %15 = vector.load %arg3[%c0_6, %c0_7, %c0_8, %c0_9] : memref<1x4x16x16xf32, #tpu.memory_space<vmem>>, vector<1x1x16x16xf32>
    %16 = vector.shape_cast %15 : vector<1x1x16x16xf32> to vector<16x16xf32>
    %c0_i32_10 = arith.constant 0 : i32
    %17 = vector.broadcast %c0_i32_10 : i32 to vector<16x16xi32>
    %18 = arith.cmpi eq, %4, %17 : vector<16x16xi32>
    %19 = arith.maximumf %13, %16 : vector<16x16xf32>
    %20 = arith.select %18, %16, %12 : vector<16x16xi1>, vector<16x16xf32>
    %21 = arith.addf %12, %20 : vector<16x16xf32>
    %c0_11 = arith.constant 0 : index
    %c1 = arith.constant 1 : index
    %c0_12 = arith.constant 0 : index
    %c0_13 = arith.constant 0 : index
    %22 = vector.load %arg3[%c0_11, %c1, %c0_12, %c0_13] : memref<1x4x16x16xf32, #tpu.memory_space<vmem>>, vector<1x1x16x16xf32>
    %23 = vector.shape_cast %22 : vector<1x1x16x16xf32> to vector<16x16xf32>
    %c1_i32 = arith.constant 1 : i32
    %24 = vector.broadcast %c1_i32 : i32 to vector<16x16xi32>
    %25 = arith.cmpi eq, %4, %24 : vector<16x16xi32>
    %26 = arith.maximumf %19, %23 : vector<16x16xf32>
    %27 = arith.select %25, %23, %12 : vector<16x16xi1>, vector<16x16xf32>
    %28 = arith.addf %21, %27 : vector<16x16xf32>
    %c0_14 = arith.constant 0 : index
    %c2 = arith.constant 2 : index
    %c0_15 = arith.constant 0 : index
    %c0_16 = arith.constant 0 : index
    %29 = vector.load %arg3[%c0_14, %c2, %c0_15, %c0_16] : memref<1x4x16x16xf32, #tpu.memory_space<vmem>>, vector<1x1x16x16xf32>
    %30 = vector.shape_cast %29 : vector<1x1x16x16xf32> to vector<16x16xf32>
    %c2_i32 = arith.constant 2 : i32
    %31 = vector.broadcast %c2_i32 : i32 to vector<16x16xi32>
    %32 = arith.cmpi eq, %4, %31 : vector<16x16xi32>
    %33 = arith.maximumf %26, %30 : vector<16x16xf32>
    %34 = arith.select %32, %30, %12 : vector<16x16xi1>, vector<16x16xf32>
    %35 = arith.addf %28, %34 : vector<16x16xf32>
    %c0_17 = arith.constant 0 : index
    %c3 = arith.constant 3 : index
    %c0_18 = arith.constant 0 : index
    %c0_19 = arith.constant 0 : index
    %36 = vector.load %arg3[%c0_17, %c3, %c0_18, %c0_19] : memref<1x4x16x16xf32, #tpu.memory_space<vmem>>, vector<1x1x16x16xf32>
    %37 = vector.shape_cast %36 : vector<1x1x16x16xf32> to vector<16x16xf32>
    %c3_i32 = arith.constant 3 : i32
    %38 = vector.broadcast %c3_i32 : i32 to vector<16x16xi32>
    %39 = arith.cmpi eq, %4, %38 : vector<16x16xi32>
    %40 = arith.maximumf %33, %37 : vector<16x16xf32>
    %41 = arith.select %39, %37, %12 : vector<16x16xi1>, vector<16x16xf32>
    %42 = arith.addf %35, %41 : vector<16x16xf32>
    %c0_20 = arith.constant 0 : index
    %c0_21 = arith.constant 0 : index
    %c0_22 = arith.constant 0 : index
    %c0_23 = arith.constant 0 : index
    %43 = vector.load %arg3[%c0_20, %c0_21, %c0_22, %c0_23] : memref<1x4x16x16xf32, #tpu.memory_space<vmem>>, vector<1x1x16x16xf32>
    %44 = vector.shape_cast %43 : vector<1x1x16x16xf32> to vector<16x16xf32>
    %45 = arith.subf %44, %40 : vector<16x16xf32>
    %46 = math.exp %45 : vector<16x16xf32>
    %47 = arith.addf %14, %46 : vector<16x16xf32>
    %c0_24 = arith.constant 0 : index
    %c1_25 = arith.constant 1 : index
    %c0_26 = arith.constant 0 : index
    %c0_27 = arith.constant 0 : index
    %48 = vector.load %arg3[%c0_24, %c1_25, %c0_26, %c0_27] : memref<1x4x16x16xf32, #tpu.memory_space<vmem>>, vector<1x1x16x16xf32>
    %49 = vector.shape_cast %48 : vector<1x1x16x16xf32> to vector<16x16xf32>
    %50 = arith.subf %49, %40 : vector<16x16xf32>
    %51 = math.exp %50 : vector<16x16xf32>
    %52 = arith.addf %47, %51 : vector<16x16xf32>
    %c0_28 = arith.constant 0 : index
    %c2_29 = arith.constant 2 : index
    %c0_30 = arith.constant 0 : index
    %c0_31 = arith.constant 0 : index
    %53 = vector.load %arg3[%c0_28, %c2_29, %c0_30, %c0_31] : memref<1x4x16x16xf32, #tpu.memory_space<vmem>>, vector<1x1x16x16xf32>
    %54 = vector.shape_cast %53 : vector<1x1x16x16xf32> to vector<16x16xf32>
    %55 = arith.subf %54, %40 : vector<16x16xf32>
    %56 = math.exp %55 : vector<16x16xf32>
    %57 = arith.addf %52, %56 : vector<16x16xf32>
    %c0_32 = arith.constant 0 : index
    %c3_33 = arith.constant 3 : index
    %c0_34 = arith.constant 0 : index
    %c0_35 = arith.constant 0 : index
    %58 = vector.load %arg3[%c0_32, %c3_33, %c0_34, %c0_35] : memref<1x4x16x16xf32, #tpu.memory_space<vmem>>, vector<1x1x16x16xf32>
    %59 = vector.shape_cast %58 : vector<1x1x16x16xf32> to vector<16x16xf32>
    %60 = arith.subf %59, %40 : vector<16x16xf32>
    %61 = math.exp %60 : vector<16x16xf32>
    %62 = arith.addf %57, %61 : vector<16x16xf32>
    %63 = math.log %62 : vector<16x16xf32>
    %64 = arith.addf %63, %40 : vector<16x16xf32>
    %65 = arith.subf %64, %42 : vector<16x16xf32>
    %c0_36 = arith.constant 0 : index
    %c0_37 = arith.constant 0 : index
    %66 = vector.load %arg6[%c0_36, %c0_37] : memref<16x16xf32, #tpu.memory_space<vmem>>, vector<16x16xf32>
    %67 = arith.mulf %65, %11 : vector<16x16xf32>
    %cst_38 = arith.constant 0.000000e+00 : f32
    %68 = vector.broadcast %cst_38 : f32 to vector<16x16xf32>
    %69 = arith.select %9, %67, %68 : vector<16x16xi1>, vector<16x16xf32>
    %70 = arith.addf %66, %69 : vector<16x16xf32>
    %c0_39 = arith.constant 0 : index
    %c0_40 = arith.constant 0 : index
    %71 = vector.load %arg6[%c0_39, %c0_40] : memref<16x16xf32, #tpu.memory_space<vmem>>, vector<16x16xf32>
    tpu.vector_store %arg6[%c0_39, %c0_40], %70 {strides = array<i32>} : memref<16x16xf32, #tpu.memory_space<vmem>>, vector<16x16xf32>,
    %c0_41 = arith.constant 0 : index
    %c0_42 = arith.constant 0 : index
    %72 = vector.load %arg7[%c0_41, %c0_42] : memref<16x16xf32, #tpu.memory_space<vmem>>, vector<16x16xf32>
    %73 = arith.addf %72, %11 : vector<16x16xf32>
    %c0_43 = arith.constant 0 : index
    %c0_44 = arith.constant 0 : index
    %74 = vector.load %arg7[%c0_43, %c0_44] : memref<16x16xf32, #tpu.memory_space<vmem>>, vector<16x16xf32>
    tpu.vector_store %arg7[%c0_43, %c0_44], %73 {strides = array<i32>} : memref<16x16xf32, #tpu.memory_space<vmem>>, vector<16x16xf32>,
    %c0_i32_45 = arith.constant 0 : i32
    %75 = arith.cmpi eq, %arg2, %c0_i32_45 : i32
    %76 = arith.extui %75 : i1 to i32
    %c0_i32_46 = arith.constant 0 : i32
    %77 = arith.cmpi ne, %76, %c0_i32_46 : i32
    scf.if %77 {
      %78 = tpu.iota {dimensions = array<i32: 1>} : vector<1x128xi32>
      %c0_47 = arith.constant 0 : index
      %c0_48 = arith.constant 0 : index
      %79 = vector.load %arg6[%c0_47, %c0_48] : memref<16x16xf32, #tpu.memory_space<vmem>>, vector<16x16xf32>
      %80 = vector.shape_cast %79 : vector<16x16xf32> to vector<1x16x16xf32>
      %cst_49 = arith.constant dense<0.000000e+00> : vector<1xf32>
      %81 = vector.multi_reduction <add>, %80, %cst_49 [1, 2] : vector<1x16x16xf32> to vector<1xf32>
      %82 = vector.shape_cast %81 : vector<1xf32> to vector<1x1x1xf32>
      %83 = vector.extract %82[0, 0, 0] : f32 from vector<1x1x1xf32>
      %84 = vector.broadcast %83 : f32 to vector<1x1xf32>
      %c0_50 = arith.constant 0 : index
      %c0_51 = arith.constant 0 : index
      %85 = vector.load %arg7[%c0_50, %c0_51] : memref<16x16xf32, #tpu.memory_space<vmem>>, vector<16x16xf32>
      %86 = vector.shape_cast %85 : vector<16x16xf32> to vector<1x16x16xf32>
      %cst_52 = arith.constant dense<0.000000e+00> : vector<1xf32>
      %87 = vector.multi_reduction <add>, %86, %cst_52 [1, 2] : vector<1x16x16xf32> to vector<1xf32>
      %88 = vector.shape_cast %87 : vector<1xf32> to vector<1x1x1xf32>
      %89 = vector.extract %88[0, 0, 0] : f32 from vector<1x1x1xf32>
      %90 = vector.broadcast %89 : f32 to vector<1x1xf32>
      %c0_i32_53 = arith.constant 0 : i32
      %91 = vector.broadcast %c0_i32_53 : i32 to vector<1x128xi32>
      %92 = arith.cmpi eq, %78, %91 : vector<1x128xi32>
      %cst_54 = arith.constant 0.000000e+00 : f32
      %93 = vector.shape_cast %84 : vector<1x1xf32> to vector<1x1xf32>
      %94 = vector.broadcast %93 : vector<1x1xf32> to vector<1x128xf32>
      %95 = vector.broadcast %cst_54 : f32 to vector<1x128xf32>
      %96 = arith.select %92, %94, %95 : vector<1x128xi1>, vector<1x128xf32>
      %c1_i32_55 = arith.constant 1 : i32
      %97 = vector.broadcast %c1_i32_55 : i32 to vector<1x128xi32>
      %98 = arith.cmpi eq, %78, %97 : vector<1x128xi32>
      %cst_56 = arith.constant 0.000000e+00 : f32
      %99 = vector.shape_cast %90 : vector<1x1xf32> to vector<1x1xf32>
      %100 = vector.broadcast %99 : vector<1x1xf32> to vector<1x128xf32>
      %101 = vector.broadcast %cst_56 : f32 to vector<1x128xf32>
      %102 = arith.select %98, %100, %101 : vector<1x128xi1>, vector<1x128xf32>
      %103 = arith.addf %96, %102 : vector<1x128xf32>
      %c0_57 = arith.constant 0 : index
      %c0_58 = arith.constant 0 : index
      %c0_59 = arith.constant 0 : index
      %c0_60 = arith.constant 0 : index
      %104 = vector.load %arg5[%c0_57, %c0_58, %c0_59, %c0_60] : memref<1x1x1x128xf32, #tpu.memory_space<vmem>>, vector<1x1x1x128xf32>
      %105 = vector.shape_cast %104 : vector<1x1x1x128xf32> to vector<1x128xf32>
      %106 = vector.shape_cast %103 : vector<1x128xf32> to vector<1x1x1x128xf32>
      tpu.vector_store %arg5[%c0_57, %c0_58, %c0_59, %c0_60], %106 {strides = array<i32>} : memref<1x1x1x128xf32, #tpu.memory_space<vmem>>, vector<1x1x1x128xf32>,
    } else {
    }
    return
  }
  func.func @transform_0(%arg0: i32, %arg1: i32, %arg2: i32) -> (i32, i32, i32, i32) {
    %c0_i32 = arith.constant 0 : i32
    %c0_i32_0 = arith.constant 0 : i32
    return %arg0, %c0_i32, %arg2, %arg1 : i32, i32, i32, i32
  }
  func.func @transform_1(%arg0: i32, %arg1: i32, %arg2: i32) -> (i32, i32, i32) {
    %c0_i32 = arith.constant 0 : i32
    return %arg0, %arg2, %arg1 : i32, i32, i32
  }
  func.func @transform_2(%arg0: i32, %arg1: i32, %arg2: i32) -> (i32, i32, i32, i32) {
    %c0_i32 = arith.constant 0 : i32
    %c0_i32_0 = arith.constant 0 : i32
    %c0_i32_1 = arith.constant 0 : i32
    return %arg0, %arg1, %c0_i32, %c0_i32_0 : i32, i32, i32, i32
  }
}

</mosaic_0001>

<bundles_post_ra>
// kernel: tpu_custom_call.1
= control target key start
LH: loop header
LB: loop body
LE: loop exit
PB: predicated region body
PF: predicated region fallthrough
CT: control target
= control target key end

     0   :  { %7 = vsyncpa [#allocation5], 0  ;;  %s1083_s0 = inlined_call_operand.hbm [shape: f32[2,4,16,16], index: 0, kind: input, shape index: {}]   ;;  %s1084_s1 = inlined_call_operand.hbm [shape: s32[2,16,16], index: 1, kind: input, shape index: {}]   ;;  %s1085_s2 = inlined_call_operand.hbm [shape: f32[2,1,1,128], index: 2, kind: output, shape index: {}]  }
   0x1   :  { %9 = vsyncpa [#allocation5 + $0x1], 0 }
   0x2   :  { %10 = vsyncpa [#allocation8], 0 }
   0x3   :  { %12 = vsyncpa [#allocation8 + $0x1], 0 }
   0x4   :  { %13 = vsyncpa [#allocation6], 0 }
   0x5   :  { %15 = vsyncpa [#allocation6 + $0x1], 0  ;;  %s804_s9 = smov 0   ;;  %s806_s10 = smov 0  }
   0x6   :  { %s808_s11 = smov 0   ;;  %s810_s12 = smov 0  }
   0x7   :  { %s812_s13 = smov 0   ;;  %s814_s14 = smov 0  }
   0x8 LB: > { %s521_s15 = sadd.s32 4294967295, %s781_s14   ;;  %s522_s16 = sadd.s32 4294967294, %s781_s14   ;;  %s781_s14 = sphi %s814_s14, %s21_s14   ;;  %s777_s13 = sphi %s812_s13, %s1101_s13   ;;  %s773_s12 = sphi %s810_s12, %s1100_s12   ;;  %s769_s11 = sphi %s808_s11, %s1099_s11   ;;  %s765_s10 = sphi %s806_s10, %s1098_s10   ;;  %s761_s9 = sphi %s804_s9, %s1097_s9  }
   0x9   : > { %s40_s17 = sadd.s32 1, %s777_s13  ;;  %s51_s18 = sadd.s32 1, %s769_s11 }
   0xa   : > { %p42_p0 = scmp.ge.s32.totalorder %s40_s17, 2  ;;  %p58_p1 = scmp.ne.s32.totalorder %s769_s11, %s765_s10 }
   0xb   : > { %p59_p2 = scmp.eq.s32.totalorder %s781_s14, 0  ;;  %p64_p3 = scmp.ne.s32.totalorder %s765_s10, %s761_s9 }
   0xc   : > { %s1103_s17 = smov (%p42_p0, %s40_s17), 0  ;;  %p65_p5 = scmp.eq.s32.totalorder %s521_s15, 0 }
   0xd   : > { %p845_p4 = por %p59_p2, %p58_p1  ;;  %s44_s20 = ssub.s32 %s777_s13, %s1103_s17 }
   0xe   : > { %p120_p6 = scmp.eq.s32.totalorder %s521_s15, 1  ;;  %p49_p7 = scmp.eq.s32.totalorder %s44_s20, 0 }
   0xf   : > { %p851_p8 = por %p65_p5, %p64_p3  ;;  %p126_p10 = scmp.eq.s32.totalorder %s522_s16, 1 }
  0x10   : > { %p855_p9 = por %p120_p6, %p58_p1  ;;  %p568_p13 = scmp.lt.s32.totalorder %s781_s14, 2 }
  0x11   : > { %s860_s23 = scalar_select %p49_p7, %s769_s11, %s51_s18  }
  0x12   : > { %p862_p11 = por %p126_p10, %p64_p3  ;;  %s869_s25 = sand.u32 1, %s769_s11  }
  0x13   : > { %s525_s26 = sshll.u32 %s869_s25, 6  ;;  %s545_s27 = sshll.u32 %s777_s13, 10 }
  0x14   : > { %s159_s30 = scalar_lea.hbm %s1083_s0, %s545_s27  ;;  %s150_s3 = scalar_lea.vmem [#allocation4], %s525_s26 }
  0x15   : > { %s160_s4 = sshll.u32 %s150_s3, 4  ;;  %p878_p0 = pnand %p568_p13, %p845_p4  ;;  %s161_s4 = int_to_ptr.vmem [resolvable:$true] %s160_s4 }
  0x16   : > { %p531_p1 = scmp.ge.s32.totalorder %s781_s14, 1  ;;  %s147_s6 = scalar_lea.sflag [#allocation5], %s869_s25 }
  0x17   : > { %p643_p2 = pneg %p878_p0  ;;  %s654_s7 = scalar_lea.vmem %s161_s4, 1024 }
  0x18   : > { %p655_p3 = scmp.ne.s32.totalorder %s161_s4, %s654_s7  ;;  %s783_s8 = smov [#allocation4]  }
  0x19   : > { %s659_s15 = sshll.u32 %s783_s8, 4  ;;  %s660_s15 = int_to_ptr.vmem [resolvable:$false] %s659_s15 }
  0x1a   : > { %p657_p5 = pnand %p655_p3, %p643_p2  ;;  %s661_s16 = scalar_lea.vmem %s660_s15, 2048 }
  0x1b   : > { %p662_p4 = scmp.lt.s32.totalorder %s161_s4, %s660_s15  ;;  %p663_p7 = scmp.lt.s32.totalorder %s661_s16, %s654_s7 }
  0x1c   : > { %p658_p6 = pneg %p657_p5 }
  0x1d   : > { %p664_p10 = por %p663_p7, %p662_p4 }
  0x1f   : > { %p665_p13 = pnand %p664_p10, %p658_p6 }
  0x21   : > { %668 = shalt.err (!%p665_p13)
}
  0x22   : > { %s784_s18 = smov 128   ;;  %s785_s19 = smov 8  }
  0x23   : > { %560 = dma.hbm_to_vmem [thread:$0]  (!%p878_p0), %s159_s30, 1024, %s161_s4, %s147_s6, %s784_s18, %s784_s18, %s785_s19  }
  0x24   : > { %p192_p3 = scmp.lt.s32.totalorder %s781_s14, 3  ;;  %s528_s20 = sshll.u32 %s869_s25, 4 }
  0x25   : > { %s546_s26 = sshll.u32 %s777_s13, 8  ;;  %s174_s7 = scalar_lea.vmem [#allocation7], %s528_s20 }
  0x26   : > { %p896_p5 = pnand %p531_p1, %p192_p3  ;;  %s183_s3 = scalar_lea.hbm %s1084_s1, %s546_s26 }
  0x27   : > { %s184_s8 = sshll.u32 %s174_s7, 4  ;;  %s171_s15 = scalar_lea.sflag [#allocation8], %s869_s25  ;;  %s185_s8 = int_to_ptr.vmem [resolvable:$true] %s184_s8 }
  0x28   : > { %s682_s16 = scalar_lea.vmem %s185_s8, 256  ;;  %s786_s30 = smov [#allocation7]  }
  0x29   : > { %p683_p6 = scmp.ne.s32.totalorder %s185_s8, %s682_s16  ;;  %s687_s4 = sshll.u32 %s786_s30, 4  ;;  %s688_s4 = int_to_ptr.vmem [resolvable:$false] %s687_s4 }
  0x2a   : > { %s689_s6 = scalar_lea.vmem %s688_s4, 512  ;;  %p690_p1 = scmp.lt.s32.totalorder %s185_s8, %s688_s4 }
  0x2b   : > { %p685_p4 = pnand %p683_p6, %p643_p2  ;;  %p691_p10 = scmp.lt.s32.totalorder %s689_s6, %s682_s16 }
  0x2d   : > { %p686_p7 = pneg %p685_p4  ;;  %p692_p13 = por %p691_p10, %p690_p1 }
  0x2f   : > { %p693_p3 = pnand %p692_p13, %p686_p7 }
  0x31   : > { %696 = shalt.err (!%p693_p3)
}
  0x32   : > { %563 = dma.hbm_to_vmem [thread:$0]  (!%p878_p0), %s183_s3, 256, %s185_s8, %s171_s15, %s784_s18, %s784_s18, %s785_s19  }
  0x33   : > { %196 = sbr.rel (%p896_p5) target bundleno = 353 (0x161), region = 28  ;;  %s912_s25 = sand.u32 (!%p896_p5), 1, %s765_s10  }
  0x34   : > { %s532_s20 = sshll.u32 (!%p896_p5), %s912_s25, 6  ;;  %s199_s26 = scalar_lea.sflag (!%p896_p5), [#allocation5], %s912_s25 }
  0x35   : > { %s916_s28 = scalar_lea.vmem (!%p896_p5), [#allocation4], %s532_s20 }
  0x38   : > { %748 = dma.done.wait (%p851_p8), %s199_s26, 1024  }
  0x39   : > { %750 = vsyncadd (%p851_p8), %s199_s26, 4294966272  ;;  %s533_s5 = sshll.u32 %s912_s25, 4  ;;  %s208_s18 = scalar_lea.sflag [#allocation8], %s912_s25 }
  0x3a   : > { %s211_s19 = scalar_lea.vmem [#allocation7], %s533_s5 }
  0x3b   : > { %752 = dma.done.wait (%p851_p8), %s208_s18, 256  }
  0x3c   : > { %754 = vsyncadd (%p851_p8), %s208_s18, 4294967040  ;;  %vm242_vm0 = vcmask 130048   ;;  %v787_v0 = vmov 0.0   ;;  %v932_v1 = vld [vmem:[%s211_s19] sm:$0xff]  ;;  %v937_v3 = vld [vmem:[%s211_s19 + $0x8] sm:$0xff]  ;;  %s542_s27 = sshll.u32 %s773_s12, 4 }
  0x3d   : > { %243 = vst.msk [vmem:[#allocation2] sm:$0xff] %vm242_vm0, %v787_v0  ;;  %244 = vst.msk [vmem:[#allocation2 + $0x8] sm:$0xff] %vm242_vm0, %v787_v0  ;;  %v935_v2 = vld [vmem:[%s916_s28] sm:$0xff]  ;;  %vm249_vm1 = vcmp.ge.s32.totalorder %v932_v1, 0  ;;  %vm251_vm2 = vcmp.ne.s32.totalorder %v932_v1, 255  ;;  %v942_v4 = vld [vmem:[%s916_s28 + $0x8] sm:$0xff]  ;;  %s410_s16 = scalar_lea.hbm %s1085_s2, %s542_s27 }
  0x3e   : > { %245 = vst.msk [vmem:[#allocation3] sm:$0xff] %vm242_vm0, %v787_v0  ;;  %246 = vst.msk [vmem:[#allocation3 + $0x8] sm:$0xff] %vm242_vm0, %v787_v0  ;;  %v945_v5 = vld [vmem:[%s916_s28 + $0x10] sm:$0xff]  ;;  %vm250_vm3 = vcmp.ge.s32.totalorder %v937_v3, 0  ;;  %vm252_vm4 = vcmp.ne.s32.totalorder %v937_v3, 255  ;;  %v950_v6 = vld [vmem:[%s916_s28 + $0x18] sm:$0xff] }
  0x3f   : > { %v272_v7 = vmax.f32 %v935_v2, %v945_v5  ;;  %v955_v8 = vld [vmem:[%s916_s28 + $0x20] sm:$0xff]  ;;  %v958_v9 = vld [vmem:[%s916_s28 + $0x28] sm:$0xff]  ;;  %vm960_vm5 = vmand %vm249_vm1, %vm251_vm2  ;;  %v273_v11 = vmax.f32 %v942_v4, %v950_v6  ;;  %vm261_vm7 = vcmp.eq.s32.totalorder %v932_v1, 0  ;;  %vm270_vm8 = vcmp.eq.s32.totalorder %v932_v1, 1  ;;  %s235_s3 = scalar_lea.vmem [#allocation9], %s912_s25  ;;  %s399_s30 = scalar_lea.sflag [#allocation6], %s912_s25 }
  0x40   : > { %vm966_vm6 = vmand %vm250_vm3, %vm252_vm4  ;;  %v971_v13 = vld [vmem:[%s916_s28 + $0x30] sm:$0xff]  ;;  %v974_v14 = vld [vmem:[%s916_s28 + $0x38] sm:$0xff]  ;;  %v980_v19 = vsel %vm960_vm5, 1.0, %v787_v0  ;;  %vm262_vm9 = vcmp.eq.s32.totalorder %v937_v3, 0  ;;  %vm271_vm10 = vcmp.eq.s32.totalorder %v937_v3, 1  ;;  %v263_v55 = vsel %vm261_vm7, %v935_v2, 0.0 }
  0x41   : > { %v283_v15 = vmax.f32 %v272_v7, %v955_v8  ;;  %v284_v16 = vmax.f32 %v273_v11, %v958_v9  ;;  %v984_v20 = vsel %vm966_vm6, 1.0, %v787_v0  ;;  %v274_v56 = vsel %vm270_vm8, %v945_v5, 0.0  ;;  %s412_s7 = sshll.u32 %s235_s3, 4  ;;  %s788_s12 = smov [#allocation9]   ;;  %s413_s7 = int_to_ptr.vmem [resolvable:$true] %s412_s7 }
  0x42   : > { %v264_v57 = vsel %vm262_vm9, %v942_v4, 0.0  ;;  %v275_v58 = vsel %vm271_vm10, %v950_v6, 0.0  ;;  %vm281_vm11 = vcmp.eq.s32.totalorder %v932_v1, 2  ;;  %vm282_vm12 = vcmp.eq.s32.totalorder %v937_v3, 2  ;;  %s697_s4 = scalar_lea.vmem %s413_s7, 16  ;;  %s701_s6 = sshll.u32 %s788_s12, 4  ;;  %s702_s6 = int_to_ptr.vmem [resolvable:$false] %s701_s6 }
  0x43   : > { %v987_v21 = vmax.f32 %v283_v15, %v971_v13  ;;  %v990_v22 = vmax.f32 %v284_v16, %v974_v14  ;;  %v276_v59 = vadd.f32 %v274_v56, %v263_v55  ;;  %v277_v60 = vadd.f32 %v275_v58, %v264_v57  ;;  %p698_p8 = scmp.ne.s32.totalorder %s413_s7, %s697_s4  ;;  %s703_s20 = scalar_lea.vmem %s702_s6, 32 }
  0x44   : > { %v285_v61 = vsel %vm281_vm11, %v955_v8, 0.0  ;;  %v286_v62 = vsel %vm282_vm12, %v958_v9, 0.0  ;;  %vm292_vm13 = vcmp.eq.s32.totalorder %v932_v1, 3  ;;  %vm293_vm14 = vcmp.eq.s32.totalorder %v937_v3, 3  ;;  %p704_p5 = scmp.lt.s32.totalorder %s413_s7, %s702_s6  ;;  %p705_p6 = scmp.lt.s32.totalorder %s703_s20, %s697_s4 }
  0x45   : > { %v351_v17 = vld [vmem:[#allocation3] sm:$0xff]  ;;  %v352_v18 = vld [vmem:[#allocation3 + $0x8] sm:$0xff]  ;;  %v300_v25 = vsub.f32 %v935_v2, %v987_v21  ;;  %v301_v26 = vsub.f32 %v942_v4, %v990_v22  ;;  %v308_v27 = vsub.f32 %v945_v5, %v987_v21  ;;  %v309_v28 = vsub.f32 %v950_v6, %v990_v22  ;;  %p699_p0 = pnand %p698_p8, %p855_p9 }
  0x46   : > { %v353_v23 = vadd.f32 %v980_v19, %v351_v17  ;;  %v354_v24 = vadd.f32 %v984_v20, %v352_v18  ;;  %v316_v29 = vsub.f32 %v955_v8, %v987_v21  ;;  %v317_v30 = vsub.f32 %v958_v9, %v990_v22  ;;  %v340_v18 = vld [vmem:[#allocation2] sm:$0xff]  ;;  %p706_p4 = por %p705_p6, %p704_p5 }
  0x47   : > { %v302_v31 = vmul.f32 1.442695, %v300_v25  ;;  %v304_v32 = vmul.f32 1.442695, %v301_v26  ;;  %v310_v33 = vmul.f32 1.442695, %v308_v27  ;;  %v324_v34 = vsub.f32 %v971_v13, %v987_v21  ;;  %p700_p2 = pneg %p699_p0 }
  0x48   : > { %355 = vst.msk [vmem:[#allocation3] sm:$0xff] %vm242_vm0, %v353_v23  ;;  %356 = vst.msk [vmem:[#allocation3 + $0x8] sm:$0xff] %vm242_vm0, %v354_v24  ;;  %v312_v35 = vmul.f32 1.442695, %v309_v28  ;;  %v325_v36 = vsub.f32 %v974_v14, %v990_v22  ;;  %v318_v37 = vmul.f32 1.442695, %v316_v29  ;;  %v287_v63 = vadd.f32 %v285_v61, %v276_v59 }
  0x49   : > { %621 = vpow2.f32 %v302_v31  ;;  %v320_v38 = vmul.f32 1.442695, %v317_v30  ;;  %v326_v39 = vmul.f32 1.442695, %v324_v34  ;;  %v288_v0 = vadd.f32 %v286_v62, %v277_v60  ;;  %v341_v23 = vld [vmem:[#allocation2 + $0x8] sm:$0xff]  ;;  %p707_p7 = pnand %p706_p4, %p700_p2 }
  0x4a   : > { %623 = vpow2.f32 %v304_v32  ;;  %v328_v40 = vmul.f32 1.442695, %v325_v36  ;;  %v296_v2 = vsel %vm292_vm13, %v971_v13, 0.0  ;;  %v297_v4 = vsel %vm293_vm14, %v974_v14, 0.0 }
  0x4b   : > { %625 = vpow2.f32 %v310_v33  ;;  %v298_v7 = vadd.f32 %v296_v2, %v287_v63  ;;  %v299_v15 = vadd.f32 %v297_v4, %v288_v0 }
  0x4c   : > { %627 = vpow2.f32 %v312_v35 }
  0x4d   : > { %629 = vpow2.f32 %v318_v37 }
  0x4e   : > { %631 = vpow2.f32 %v320_v38 }
  0x4f   : > { %633 = vpow2.f32 %v326_v39 }
  0x50   : > { %635 = vpow2.f32 %v328_v40 }
  0x56   : > { %v622_v41 = vpop.eup %621 }
  0x57   : > { %v624_v42 = vpop.eup %623 }
  0x58   : > { %v626_v43 = vpop.eup %625 }
  0x59   : > { %v628_v44 = vpop.eup %627  ;;  %v314_v45 = vadd.f32 %v626_v43, %v622_v41 }
  0x5a   : > { %v630_v46 = vpop.eup %629  ;;  %v315_v47 = vadd.f32 %v628_v44, %v624_v42 }
  0x5b   : > { %v632_v48 = vpop.eup %631  ;;  %v322_v49 = vadd.f32 %v630_v46, %v314_v45  ;;  %v360_v45 = vlaneseq }
  0x5c   : > { %v634_v50 = vpop.eup %633  ;;  %v323_v51 = vadd.f32 %v632_v48, %v315_v47 }
  0x5d   : > { %v636_v52 = vpop.eup %635  ;;  %v330_v53 = vadd.f32 %v634_v50, %v322_v49  ;;  %v361_v46 = vand.u32 127, %v360_v45 }
  0x5e   : > { %v331_v54 = vadd.f32 %v636_v52, %v323_v51 }
  0x5f   : > { %637 = vlog2.f32 %v330_v53  ;;  %vm390_vm15 = vcmp.eq.s32.totalorder %v361_v46, 0 }
  0x60   : > { %639 = vlog2.f32 %v331_v54 }
  0x6c   : > { %v638_v5 = vpop.eup %637 }
  0x6d   : > { %v640_v6 = vpop.eup %639  ;;  %v333_v11 = vmul.f32 0.6931472, %v638_v5 }
  0x6e   : > { %v335_v16 = vmul.f32 0.6931472, %v640_v6 }
  0x6f   : > { %v336_v8 = vadd.f32 %v333_v11, %v987_v21  ;;  %v376_v21 = vld [vmem:[#allocation3] sm:$0xff] }
  0x70   : > { %v337_v9 = vadd.f32 %v335_v16, %v990_v22  ;;  %v377_v22 = vld [vmem:[#allocation3 + $0x8] sm:$0xff]  ;;  %v378_v10 = vsel %vm242_vm0, %v376_v21, 0.0 }
  0x71   : > { %v338_v17 = vsub.f32 %v336_v8, %v298_v7  ;;  %v379_v29 = vsel %vm242_vm0, %v377_v22, 0.0 }
  0x72   : > { %v339_v1 = vsub.f32 %v337_v9, %v299_v15  ;;  %v380_v30 = vadd.f32 %v379_v29, %v378_v10 }
  0x73   : > { %v342_v3 = vmul.f32 %v980_v19, %v338_v17 }
  0x74   : > { %v343_v13 = vmul.f32 %v984_v20, %v339_v1 }
  0x75   : > { %v344_v14 = vsel %vm960_vm5, %v342_v3, 0.0 }
  0x76   : > { %v345_v24 = vsel %vm966_vm6, %v343_v13, 0.0  ;;  %v346_v25 = vadd.f32 %v344_v14, %v340_v18 }
  0x77   : > { %v347_v26 = vadd.f32 %v345_v24, %v341_v23 }
  0x78   : > { %349 = vst.msk [vmem:[#allocation2] sm:$0xff] %vm242_vm0, %v346_v25 }
  0x79   : > { %350 = vst.msk [vmem:[#allocation2 + $0x8] sm:$0xff] %vm242_vm0, %v347_v26 }
  0x7f   : > { %v362_v27 = vld [vmem:[#allocation2] sm:$0xff] }
  0x80   : > { %v363_v28 = vld [vmem:[#allocation2 + $0x8] sm:$0xff]  ;;  %v364_v19 = vsel %vm242_vm0, %v362_v27, 0.0 }
  0x81   : > { %v365_v20 = vsel %vm242_vm0, %v363_v28, 0.0  ;;  %vm393_vm0 = vcmp.eq.s32.totalorder %v361_v46, 1 }
  0x82   : > { %v366_v12 = vadd.f32 %v365_v20, %v364_v19 }
  0x84   : > { %367 = vadd.xlane.f32.xlu0 %v366_v12 }
  0x88   : > { %381 = vadd.xlane.f32.xlu0 %v380_v30 }
 0x10d   : > { %v368_v31 = vpop.xlane.xlu0 %367 }
 0x10e   : > { %v369_v32 = vrot.slane %v368_v31, 4 }
 0x110   : > { %v370_v33 = vadd.f32 %v369_v32, %v368_v31 }
 0x111   : > { %v382_v34 = vpop.xlane.xlu0 %381 }
 0x112   : > { %v371_v35 = vrot.slane %v370_v33, 2  ;;  %v383_v36 = vrot.slane %v382_v34, 4 }
 0x114   : > { %v384_v37 = vadd.f32 %v383_v36, %v382_v34  ;;  %v372_v38 = vadd.f32 %v371_v35, %v370_v33 }
 0x116   : > { %v385_v39 = vrot.slane %v384_v37, 2  ;;  %v373_v40 = vrot.slane %v372_v38, 1 }
 0x118   : > { %v386_v41 = vadd.f32 %v385_v39, %v384_v37  ;;  %v374_v42 = vadd.f32 %v373_v40, %v372_v38 }
 0x11a   : > { %547 = vpush %v374_v42  ;;  %v387_v43 = vrot.slane %v386_v41, 1 }
 0x11c   : > { %v388_v44 = vadd.f32 %v387_v43, %v386_v41 }
 0x11e   : > { %549 = vpush %v388_v44 }
 0x14b   : > { %s548_s21 = spop %547 }
 0x14c   : > { %v391_v47 = vstv %s548_s21 }
 0x14d   : > { %v392_v49 = vsel %vm390_vm15, %v391_v47, 0.0 }
 0x14f   : > { %s550_s29 = spop %549 }
 0x150   : > { %v394_v48 = vstv %s550_s29 }
 0x151   : > { %v395_v50 = vsel %vm393_vm0, %v394_v48, 0.0 }
 0x152   : > { %v396_v51 = vadd.f32 %v395_v50, %v392_v49 }
 0x154   : > { %397 = vst [vmem:[%s235_s3] sm:$0x1] %v396_v51 }
 0x155   : > { %710 = shalt.err (!%p707_p7)
}
 0x156   : > { %s711_s26 = scalar_lea.hbm %s410_s16, 16  ;;  %s715_s5 = scalar_lea.hbm %s1085_s2, 32 }
 0x157   : > { %p712_p1 = scmp.ne.s32.totalorder %s410_s16, %s711_s26  ;;  %p716_p3 = scmp.lt.s32.totalorder %s410_s16, %s1085_s2 }
 0x158   : > { %p717_p8 = scmp.lt.s32.totalorder %s715_s5, %s711_s26 }
 0x159   : > { %p713_p10 = pnand %p712_p1, %p855_p9 }
 0x15a   : > { %p718_p0 = por %p717_p8, %p716_p3 }
 0x15b   : > { %p714_p13 = pneg %p713_p10 }
 0x15d   : > { %p719_p12 = pnand %p718_p0, %p714_p13 }
 0x15f   : > { %722 = shalt.err (!%p719_p12)
}
 0x160   : > { %555 = dma.vmem_to_hbm [thread:$0]  (%p855_p9), %s413_s7, 16, %s410_s16, %s399_s30  }
 0x161 PF: > { %s424_s21 = sand.u32 1, %s761_s9   ;;  %p1096_p2 = scmp.ge.s32.totalorder %s781_s14, 2 }
 0x162   : > { %s425_s27 = scalar_lea.sflag [#allocation6], %s424_s21 }
 0x163   : > { %p565_p5 = pnand %p1096_p2, %p862_p11 }
 0x165   : > { %p566_p6 = pneg %p565_p5 }
 0x167   : > { %756 = dma.done.wait (%p566_p6), %s425_s27, 16  }
 0x168   : > { %758 = vsyncadd (%p566_p6), %s425_s27, 4294967280  ;;  %s21_s14 = sadd.s32 1, %s781_s14   ;;  %s1097_s9 = smov %s765_s10 }
 0x169   : > { %p18_p4 = scmp.ge.s32.totalorder %s21_s14, 4   ;;  %s1098_s10 = smov %s769_s11 }
 0x16a   : > { %s1099_s11 = smov %s860_s23  ;;  %s1100_s12 = smov %s777_s13 }
 0x16b   : > { %s1101_s13 = smov %s1103_s17  ;;  %20 = sbr.rel (!%p18_p4) target bundleno = 8 (0x8), region = 97 }
 0x170   :  { %429 = vsyncpa [#allocation5], 1 }
 0x171   :  { %431 = vsyncpa [#allocation5 + $0x1], 1 }
 0x172   :  { %432 = vsyncpa [#allocation8], 1 }
 0x173   :  { %434 = vsyncpa [#allocation8 + $0x1], 1 }
 0x174   :  { %435 = vsyncpa [#allocation6], 1 }
 0x175   :  { %437 = vsyncpa [#allocation6 + $0x1], 1 }

</bundles_post_ra>
